<compile_context>
chip_gen: v6e
topology: v6e:2x2x1
jax: 0.10.0
libtpu: 0.0.40
codegen_flags: <defaults>
</compile_context>

<pallas_src>
import functools

import jax
import jax.numpy as jnp
from jax.experimental import pallas as pl
from jax.experimental.pallas import tpu as pltpu

LEAKY_SLOPE = 0.01  # nn.LeakyReLU default
BN_EPS = 1e-5       # nn.BatchNorm1d default


def _round_up(n, m):
    return ((n + m - 1) // m) * m


def _prefers_bf16_elementwise():
    """bf16 elementwise only where the VPU has a bf16 path (v6e / v7x and newer)."""
    try:
        kind = jax.devices()[0].device_kind.lower()
    except Exception:
        return True
    return not any(v in kind for v in ("v2", "v3", "v4", "v5"))


def _pick_tm(batch, tm_max):
    """Batch tile selection: clamp to real work; ensure >=2 steps for megacore."""
    tm = min(tm_max, _round_up(batch, 16))  # 16 keeps bf16 sublane packing legal
    # v7x has 2 TensorCores: give the "parallel" batch axis >= 2 grid steps when
    # there is enough work to split. Harmless (sequential loop) on v5e/v6e.
    if batch >= 512 and pl.cdiv(batch, tm) < 2:
        tm = _round_up(pl.cdiv(batch, 2), 16)
    return max(tm, 16)


def feedforward_kernel(
    x_ref,
    w1_ref, b1_ref,
    w2_ref, b2_ref,
    sc2b_ref, sh2b_ref,
    w3_ref, b3_ref,
    w4_ref, b4_ref,
    w5_ref, b5_ref,
    w6_ref, b6_ref,
    o_ref,
    *, ew_bf16,
):
    ew = jnp.bfloat16 if ew_bf16 else jnp.float32

    def dense_leaky(h, w_ref, b_ref):
        # bf16 MXU feed, f32 accumulation; bias add + LeakyReLU in `ew` dtype.
        acc = jnp.dot(h.astype(jnp.bfloat16), w_ref[...],
                      preferred_element_type=jnp.float32)
        v = acc.astype(ew) + b_ref[...].astype(ew)
        return jnp.maximum(v, LEAKY_SLOPE * v)

    x = x_ref[...]                        # (TM, d_pad) bf16

    h = dense_leaky(x, w1_ref, b1_ref)    # Linear(d, 512) + folded BN(512) -> leaky
    h = dense_leaky(h, w2_ref, b2_ref)    # Linear(512, 256) + folded BN(256) -> leaky

    # Standalone BN(256) (follows a LeakyReLU in the module; cannot be folded) -> leaky
    v = h * sc2b_ref[...].astype(ew) + sh2b_ref[...].astype(ew)
    h = jnp.maximum(v, LEAKY_SLOPE * v)

    h = dense_leaky(h, w3_ref, b3_ref)    # Linear(256, 128) + folded BN(128) -> leaky
    h = dense_leaky(h, w4_ref, b4_ref)    # Linear(128, 64)  + folded BN(64)  -> leaky

    # Tail matmuls (N=4, N=out) are tiny: f32 weights/math for accuracy, MXU cost nil.
    h = h.astype(jnp.float32)
    v = jnp.dot(h, w5_ref[...], preferred_element_type=jnp.float32) + b5_ref[...]
    h = jnp.maximum(v, LEAKY_SLOPE * v)   # Linear(64, 4) + folded BN(4) -> leaky
    logits = jnp.dot(h, w6_ref[...], preferred_element_type=jnp.float32) + b6_ref[...]

    # Sigmoid: exp (EUP) + approx reciprocal (EUP) -- off the VPU critical path.
    o_ref[...] = pl.reciprocal(1.0 + jnp.exp(-logits), approx=True)


def make_params(input_dim, output_dim, key):
    """Deterministic parameter construction (synthetic, not a checkpoint)."""
    dims = [(input_dim, 512), (512, 256), (256, 128), (128, 64), (64, 4), (4, output_dim)]
    bn_dims = [512, 256, 256, 128, 64, 4]  # third entry is the standalone BN(256)

    keys = jax.random.split(key, 64)
    ki = iter(range(64))

    linears = []
    for (fan_in, fan_out) in dims:
        bound = 1.0 / jnp.sqrt(fan_in)
        w = jax.random.uniform(keys[next(ki)], (fan_in, fan_out), jnp.float32, -bound, bound)
        b = jax.random.uniform(keys[next(ki)], (1, fan_out), jnp.float32, -bound, bound)
        linears.append((w, b))

    bn_affines = []  # eval-mode BN (scale, shift) per layer, shape (1, d)
    for d in bn_dims:
        gamma = 1.0 + 0.1 * jax.random.normal(keys[next(ki)], (1, d), jnp.float32)
        beta = 0.1 * jax.random.normal(keys[next(ki)], (1, d), jnp.float32)
        running_mean = 0.1 * jax.random.normal(keys[next(ki)], (1, d), jnp.float32)
        running_var = jnp.abs(1.0 + 0.1 * jax.random.normal(keys[next(ki)], (1, d), jnp.float32))
        scale = gamma / jnp.sqrt(running_var + BN_EPS)
        shift = beta - running_mean * scale
        bn_affines.append((scale, shift))

    return linears, bn_affines


def fold_params(linears, bn_affines):
    """Fold each eval-mode BN into its preceding Linear; bf16 weights for the big
    layers, f32 weights for the tiny tail; f32 biases; W1 rows padded to 128."""
    (w1, b1), (w2, b2), (w3, b3), (w4, b4), (w5, b5), (w6, b6) = linears
    (sc1, sh1), (sc2, sh2), (sc2b, sh2b), (sc3, sh3), (sc4, sh4), (sc5, sh5) = bn_affines

    def fold(w, b, sc, sh, wdtype):
        return (w * sc).astype(wdtype), (b * sc + sh).astype(jnp.float32)

    fw1, fb1 = fold(w1, b1, sc1, sh1, jnp.bfloat16)
    fw2, fb2 = fold(w2, b2, sc2, sh2, jnp.bfloat16)
    fw3, fb3 = fold(w3, b3, sc3, sh3, jnp.bfloat16)
    fw4, fb4 = fold(w4, b4, sc4, sh4, jnp.bfloat16)
    fw5, fb5 = fold(w5, b5, sc5, sh5, jnp.float32)   # tiny tail: keep f32
    fw6, fb6 = w6.astype(jnp.float32), b6.astype(jnp.float32)

    # Lane-dense input DMA: pad the feature dim to a multiple of 128 with zero
    # rows in W1 (the wrapper zero-pads x columns to match; math is unchanged).
    d_in = fw1.shape[0]
    d_pad = _round_up(d_in, 128)
    if d_pad != d_in:
        fw1 = jnp.pad(fw1, ((0, d_pad - d_in), (0, 0)))

    return (fw1, fb1, fw2, fb2,
            sc2b.astype(jnp.float32), sh2b.astype(jnp.float32),
            fw3, fb3, fw4, fb4, fw5, fb5, fw6, fb6)


@functools.partial(jax.jit, static_argnames=("output_dim", "tm", "ew_bf16"))
def _feedforward_impl(x, folded, output_dim, tm, ew_bf16):
    b, d_in = x.shape
    d_pad = folded[0].shape[0]
    if d_in != d_pad:                                  # lane-dense feature padding
        x = jnp.pad(x, ((0, 0), (0, d_pad - d_in)))
    padded_b = pl.cdiv(b, tm) * tm
    if padded_b != b:
        x = jnp.pad(x, ((0, padded_b - b), (0, 0)))
    x = x.astype(jnp.bfloat16)

    grid = (padded_b // tm,)
    kernel = functools.partial(feedforward_kernel, ew_bf16=ew_bf16)

    # x/out: batch-tiled. Weights/biases: whole-array blocks with constant
    # index_maps so they stay VMEM-resident across grid steps (< 1 MiB total).
    in_specs = [pl.BlockSpec((tm, d_pad), lambda i: (i, 0))]
    in_specs += [pl.BlockSpec(a.shape, lambda i: (0, 0)) for a in folded]
    out_spec = pl.BlockSpec((tm, output_dim), lambda i: (i, 0))

    out = pl.pallas_call(
        kernel,
        out_shape=jax.ShapeDtypeStruct((padded_b, output_dim), jnp.float32),
        grid=grid,
        in_specs=in_specs,
        out_specs=out_spec,
        compiler_params=pltpu.CompilerParams(
            dimension_semantics=("parallel",),
            # Safe at tm <= 1024 on every generation (incl. v7x's 64 MiB VMEM);
            # leaves headroom for double-buffered x tiles + f32 intermediates.
            vmem_limit_bytes=32 * 1024 * 1024,
        ),
    )(x, *folded)
    return out[:b]


def feedforward(x, folded, output_dim, tm=1024, ew_bf16=None):
    if ew_bf16 is None:
        ew_bf16 = _prefers_bf16_elementwise()
    tm_eff = _pick_tm(x.shape[0], tm)
    return _feedforward_impl(x, folded, output_dim, tm_eff, ew_bf16)


def reference(x, linears, bn_affines):
    """Pure-JAX f32 reference of the same eval-mode forward (unfolded params)."""
    (w1, b1), (w2, b2), (w3, b3), (w4, b4), (w5, b5), (w6, b6) = linears
    (sc1, sh1), (sc2, sh2), (sc2b, sh2b), (sc3, sh3), (sc4, sh4), (sc5, sh5) = bn_affines

    def leaky(v):
        return jnp.where(v >= 0, v, LEAKY_SLOPE * v)

    h = leaky((x @ w1 + b1) * sc1 + sh1)
    h = leaky((h @ w2 + b2) * sc2 + sh2)
    h = leaky(h * sc2b + sh2b)
    h = leaky((h @ w3 + b3) * sc3 + sh3)
    h = leaky((h @ w4 + b4) * sc4 + sh4)
    h = leaky((h @ w5 + b5) * sc5 + sh5)
    return jax.nn.sigmoid(h @ w6 + b6)


if __name__ == "__main__":
    input_dim, output_dim, batch = 32, 8, 8

    key = jax.random.PRNGKey(0)
    kx, kp, kx2 = jax.random.split(key, 3)
    linears, bn_affines = make_params(input_dim, output_dim, kp)
    folded = fold_params(linears, bn_affines)

    # Small inference-style batch (tile clamped to 16, single grid step).
    x = jax.random.normal(kx, (batch, input_dim), jnp.float32)
    out = jax.block_until_ready(feedforward(x, folded, output_dim))
    ref = reference(x, linears, bn_affines)
    assert out.shape == (batch, output_dim)
    # bf16 matmul weights / elementwise + approx reciprocal -> loosened tolerance.
    assert jnp.allclose(out, ref, atol=3e-2, rtol=3e-2), (
        float(jnp.max(jnp.abs(out - ref))))

    # Larger batch exercising the tiled / multi-step (megacore-split) path + padding.
    x2 = jax.random.normal(kx2, (600, input_dim), jnp.float32)
    out2 = jax.block_until_ready(feedforward(x2, folded, output_dim))
    ref2 = reference(x2, linears, bn_affines)
    assert out2.shape == (600, output_dim)
    assert jnp.allclose(out2, ref2, atol=3e-2, rtol=3e-2), (
        float(jnp.max(jnp.abs(out2 - ref2))))

    print("KERNEL_OK")
</pallas_src>

<mosaic_0001>
module attributes {stable_mosaic.version = 11 : i64} {
  func.func @feedforward_kernel(%arg0: i32, %arg1: memref<16x128xbf16, #tpu.memory_space<vmem>>, %arg2: memref<128x512xbf16, #tpu.memory_space<vmem>>, %arg3: memref<1x512xf32, #tpu.memory_space<vmem>>, %arg4: memref<512x256xbf16, #tpu.memory_space<vmem>>, %arg5: memref<1x256xf32, #tpu.memory_space<vmem>>, %arg6: memref<1x256xf32, #tpu.memory_space<vmem>>, %arg7: memref<1x256xf32, #tpu.memory_space<vmem>>, %arg8: memref<256x128xbf16, #tpu.memory_space<vmem>>, %arg9: memref<1x128xf32, #tpu.memory_space<vmem>>, %arg10: memref<128x64xbf16, #tpu.memory_space<vmem>>, %arg11: memref<1x64xf32, #tpu.memory_space<vmem>>, %arg12: memref<64x4xf32, #tpu.memory_space<vmem>>, %arg13: memref<1x4xf32, #tpu.memory_space<vmem>>, %arg14: memref<4x8xf32, #tpu.memory_space<vmem>>, %arg15: memref<1x8xf32, #tpu.memory_space<vmem>>, %arg16: memref<16x8xf32, #tpu.memory_space<vmem>>) attributes {dimension_semantics = [#tpu.dimension_semantics<parallel>], iteration_bounds = array<i64: 1>, scalar_prefetch = 0 : i64, scratch_operands = 0 : i64, tpu.core_type = #tpu.core_type<tc>, window_params = [{transform_indices = @transform_0, window_bounds = array<i64: 16, 128>}, {pipeline_mode = #tpu.pipeline_mode<synchronous>, transform_indices = @transform_1, window_bounds = array<i64: 128, 512>}, {pipeline_mode = #tpu.pipeline_mode<synchronous>, transform_indices = @transform_2, window_bounds = array<i64: 1, 512>}, {pipeline_mode = #tpu.pipeline_mode<synchronous>, transform_indices = @transform_3, window_bounds = array<i64: 512, 256>}, {pipeline_mode = #tpu.pipeline_mode<synchronous>, transform_indices = @transform_4, window_bounds = array<i64: 1, 256>}, {pipeline_mode = #tpu.pipeline_mode<synchronous>, transform_indices = @transform_5, window_bounds = array<i64: 1, 256>}, {pipeline_mode = #tpu.pipeline_mode<synchronous>, transform_indices = @transform_6, window_bounds = array<i64: 1, 256>}, {pipeline_mode = #tpu.pipeline_mode<synchronous>, transform_indices = @transform_7, window_bounds = array<i64: 256, 128>}, {pipeline_mode = #tpu.pipeline_mode<synchronous>, transform_indices = @transform_8, window_bounds = array<i64: 1, 128>}, {pipeline_mode = #tpu.pipeline_mode<synchronous>, transform_indices = @transform_9, window_bounds = array<i64: 128, 64>}, {pipeline_mode = #tpu.pipeline_mode<synchronous>, transform_indices = @transform_10, window_bounds = array<i64: 1, 64>}, {pipeline_mode = #tpu.pipeline_mode<synchronous>, transform_indices = @transform_11, window_bounds = array<i64: 64, 4>}, {pipeline_mode = #tpu.pipeline_mode<synchronous>, transform_indices = @transform_12, window_bounds = array<i64: 1, 4>}, {pipeline_mode = #tpu.pipeline_mode<synchronous>, transform_indices = @transform_13, window_bounds = array<i64: 4, 8>}, {pipeline_mode = #tpu.pipeline_mode<synchronous>, transform_indices = @transform_14, window_bounds = array<i64: 1, 8>}, {transform_indices = @transform_15, window_bounds = array<i64: 16, 8>}]} {
    %c0 = arith.constant 0 : index
    %c0_0 = arith.constant 0 : index
    %0 = vector.load %arg1[%c0, %c0_0] : memref<16x128xbf16, #tpu.memory_space<vmem>>, vector<16x128xbf16>
    %c0_1 = arith.constant 0 : index
    %c0_2 = arith.constant 0 : index
    %1 = vector.load %arg2[%c0_1, %c0_2] : memref<128x512xbf16, #tpu.memory_space<vmem>>, vector<128x512xbf16>
    %cst = arith.constant dense<0.000000e+00> : vector<16x512xf32>
    %2 = tpu.matmul %0, %1, %cst {dimension_numbers = #tpu.dot_dimension_numbers<[1], [0], [0], [1], [0, 0, 1, 1], [], []>} : vector<16x128xbf16>, vector<128x512xbf16>, vector<16x512xf32> -> vector<16x512xf32>
    %3 = arith.truncf %2 : vector<16x512xf32> to vector<16x512xbf16>
    %c0_3 = arith.constant 0 : index
    %c0_4 = arith.constant 0 : index
    %4 = vector.load %arg3[%c0_3, %c0_4] : memref<1x512xf32, #tpu.memory_space<vmem>>, vector<1x512xf32>
    %5 = arith.truncf %4 : vector<1x512xf32> to vector<1x512xbf16>
    %6 = vector.broadcast %5 : vector<1x512xbf16> to vector<16x512xbf16>
    %7 = arith.addf %3, %6 : vector<16x512xbf16>
    %cst_5 = arith.constant 1.000980e-02 : bf16
    %8 = vector.broadcast %cst_5 : bf16 to vector<16x512xbf16>
    %9 = arith.mulf %8, %7 : vector<16x512xbf16>
    %10 = arith.maximumf %7, %9 : vector<16x512xbf16>
    %c0_6 = arith.constant 0 : index
    %c0_7 = arith.constant 0 : index
    %11 = vector.load %arg4[%c0_6, %c0_7] : memref<512x256xbf16, #tpu.memory_space<vmem>>, vector<512x256xbf16>
    %cst_8 = arith.constant dense<0.000000e+00> : vector<16x256xf32>
    %12 = tpu.matmul %10, %11, %cst_8 {dimension_numbers = #tpu.dot_dimension_numbers<[1], [0], [0], [1], [0, 0, 1, 1], [], []>} : vector<16x512xbf16>, vector<512x256xbf16>, vector<16x256xf32> -> vector<16x256xf32>
    %13 = arith.truncf %12 : vector<16x256xf32> to vector<16x256xbf16>
    %c0_9 = arith.constant 0 : index
    %c0_10 = arith.constant 0 : index
    %14 = vector.load %arg5[%c0_9, %c0_10] : memref<1x256xf32, #tpu.memory_space<vmem>>, vector<1x256xf32>
    %15 = arith.truncf %14 : vector<1x256xf32> to vector<1x256xbf16>
    %16 = vector.broadcast %15 : vector<1x256xbf16> to vector<16x256xbf16>
    %17 = arith.addf %13, %16 : vector<16x256xbf16>
    %cst_11 = arith.constant 1.000980e-02 : bf16
    %18 = vector.broadcast %cst_11 : bf16 to vector<16x256xbf16>
    %19 = arith.mulf %18, %17 : vector<16x256xbf16>
    %20 = arith.maximumf %17, %19 : vector<16x256xbf16>
    %c0_12 = arith.constant 0 : index
    %c0_13 = arith.constant 0 : index
    %21 = vector.load %arg6[%c0_12, %c0_13] : memref<1x256xf32, #tpu.memory_space<vmem>>, vector<1x256xf32>
    %22 = arith.truncf %21 : vector<1x256xf32> to vector<1x256xbf16>
    %23 = vector.broadcast %22 : vector<1x256xbf16> to vector<16x256xbf16>
    %24 = arith.mulf %20, %23 : vector<16x256xbf16>
    %c0_14 = arith.constant 0 : index
    %c0_15 = arith.constant 0 : index
    %25 = vector.load %arg7[%c0_14, %c0_15] : memref<1x256xf32, #tpu.memory_space<vmem>>, vector<1x256xf32>
    %26 = arith.truncf %25 : vector<1x256xf32> to vector<1x256xbf16>
    %27 = vector.broadcast %26 : vector<1x256xbf16> to vector<16x256xbf16>
    %28 = arith.addf %24, %27 : vector<16x256xbf16>
    %cst_16 = arith.constant 1.000980e-02 : bf16
    %29 = vector.broadcast %cst_16 : bf16 to vector<16x256xbf16>
    %30 = arith.mulf %29, %28 : vector<16x256xbf16>
    %31 = arith.maximumf %28, %30 : vector<16x256xbf16>
    %c0_17 = arith.constant 0 : index
    %c0_18 = arith.constant 0 : index
    %32 = vector.load %arg8[%c0_17, %c0_18] : memref<256x128xbf16, #tpu.memory_space<vmem>>, vector<256x128xbf16>
    %cst_19 = arith.constant dense<0.000000e+00> : vector<16x128xf32>
    %33 = tpu.matmul %31, %32, %cst_19 {dimension_numbers = #tpu.dot_dimension_numbers<[1], [0], [0], [1], [0, 0, 1, 1], [], []>} : vector<16x256xbf16>, vector<256x128xbf16>, vector<16x128xf32> -> vector<16x128xf32>
    %34 = arith.truncf %33 : vector<16x128xf32> to vector<16x128xbf16>
    %c0_20 = arith.constant 0 : index
    %c0_21 = arith.constant 0 : index
    %35 = vector.load %arg9[%c0_20, %c0_21] : memref<1x128xf32, #tpu.memory_space<vmem>>, vector<1x128xf32>
    %36 = arith.truncf %35 : vector<1x128xf32> to vector<1x128xbf16>
    %37 = vector.broadcast %36 : vector<1x128xbf16> to vector<16x128xbf16>
    %38 = arith.addf %34, %37 : vector<16x128xbf16>
    %cst_22 = arith.constant 1.000980e-02 : bf16
    %39 = vector.broadcast %cst_22 : bf16 to vector<16x128xbf16>
    %40 = arith.mulf %39, %38 : vector<16x128xbf16>
    %41 = arith.maximumf %38, %40 : vector<16x128xbf16>
    %c0_23 = arith.constant 0 : index
    %c0_24 = arith.constant 0 : index
    %42 = vector.load %arg10[%c0_23, %c0_24] : memref<128x64xbf16, #tpu.memory_space<vmem>>, vector<128x64xbf16>
    %cst_25 = arith.constant dense<0.000000e+00> : vector<16x64xf32>
    %43 = tpu.matmul %41, %42, %cst_25 {dimension_numbers = #tpu.dot_dimension_numbers<[1], [0], [0], [1], [0, 0, 1, 1], [], []>} : vector<16x128xbf16>, vector<128x64xbf16>, vector<16x64xf32> -> vector<16x64xf32>
    %44 = arith.truncf %43 : vector<16x64xf32> to vector<16x64xbf16>
    %c0_26 = arith.constant 0 : index
    %c0_27 = arith.constant 0 : index
    %45 = vector.load %arg11[%c0_26, %c0_27] : memref<1x64xf32, #tpu.memory_space<vmem>>, vector<1x64xf32>
    %46 = arith.truncf %45 : vector<1x64xf32> to vector<1x64xbf16>
    %47 = vector.broadcast %46 : vector<1x64xbf16> to vector<16x64xbf16>
    %48 = arith.addf %44, %47 : vector<16x64xbf16>
    %cst_28 = arith.constant 1.000980e-02 : bf16
    %49 = vector.broadcast %cst_28 : bf16 to vector<16x64xbf16>
    %50 = arith.mulf %49, %48 : vector<16x64xbf16>
    %51 = arith.maximumf %48, %50 : vector<16x64xbf16>
    %52 = arith.extf %51 : vector<16x64xbf16> to vector<16x64xf32>
    %c0_29 = arith.constant 0 : index
    %c0_30 = arith.constant 0 : index
    %53 = vector.load %arg12[%c0_29, %c0_30] : memref<64x4xf32, #tpu.memory_space<vmem>>, vector<64x4xf32>
    %cst_31 = arith.constant dense<0.000000e+00> : vector<16x4xf32>
    %54 = tpu.matmul %52, %53, %cst_31 {dimension_numbers = #tpu.dot_dimension_numbers<[1], [0], [0], [1], [0, 0, 1, 1], [], []>} : vector<16x64xf32>, vector<64x4xf32>, vector<16x4xf32> -> vector<16x4xf32>
    %c0_32 = arith.constant 0 : index
    %c0_33 = arith.constant 0 : index
    %55 = vector.load %arg13[%c0_32, %c0_33] : memref<1x4xf32, #tpu.memory_space<vmem>>, vector<1x4xf32>
    %56 = vector.broadcast %55 : vector<1x4xf32> to vector<16x4xf32>
    %57 = arith.addf %54, %56 : vector<16x4xf32>
    %cst_34 = arith.constant 0.00999999977 : f32
    %58 = vector.broadcast %cst_34 : f32 to vector<16x4xf32>
    %59 = arith.mulf %58, %57 : vector<16x4xf32>
    %60 = arith.maximumf %57, %59 : vector<16x4xf32>
    %c0_35 = arith.constant 0 : index
    %c0_36 = arith.constant 0 : index
    %61 = vector.load %arg14[%c0_35, %c0_36] : memref<4x8xf32, #tpu.memory_space<vmem>>, vector<4x8xf32>
    %cst_37 = arith.constant dense<0.000000e+00> : vector<16x8xf32>
    %62 = tpu.matmul %60, %61, %cst_37 {dimension_numbers = #tpu.dot_dimension_numbers<[1], [0], [0], [1], [0, 0, 1, 1], [], []>} : vector<16x4xf32>, vector<4x8xf32>, vector<16x8xf32> -> vector<16x8xf32>
    %c0_38 = arith.constant 0 : index
    %c0_39 = arith.constant 0 : index
    %63 = vector.load %arg15[%c0_38, %c0_39] : memref<1x8xf32, #tpu.memory_space<vmem>>, vector<1x8xf32>
    %64 = vector.broadcast %63 : vector<1x8xf32> to vector<16x8xf32>
    %65 = arith.addf %62, %64 : vector<16x8xf32>
    %cst_40 = arith.constant 0.000000e+00 : f32
    %66 = vector.broadcast %cst_40 : f32 to vector<16x8xf32>
    %67 = arith.subf %66, %65 : vector<16x8xf32>
    %68 = math.exp %67 : vector<16x8xf32>
    %cst_41 = arith.constant 1.000000e+00 : f32
    %69 = vector.broadcast %cst_41 : f32 to vector<16x8xf32>
    %70 = arith.addf %69, %68 : vector<16x8xf32>
    %71 = tpu.reciprocal %70 {approx = true} : vector<16x8xf32> -> vector<16x8xf32>
    %c0_42 = arith.constant 0 : index
    %c0_43 = arith.constant 0 : index
    %72 = vector.load %arg16[%c0_42, %c0_43] : memref<16x8xf32, #tpu.memory_space<vmem>>, vector<16x8xf32>
    tpu.vector_store %arg16[%c0_42, %c0_43], %71 {strides = array<i32>} : memref<16x8xf32, #tpu.memory_space<vmem>>, vector<16x8xf32>,
    return
  }
  func.func @transform_0(%arg0: i32) -> (i32, i32) {
    %c0_i32 = arith.constant 0 : i32
    %c0_i32_0 = arith.constant 0 : i32
    return %arg0, %c0_i32 : i32, i32
  }
  func.func @transform_1(%arg0: i32) -> (i32, i32) {
    %c0_i32 = arith.constant 0 : i32
    %c0_i32_0 = arith.constant 0 : i32
    %c0_i32_1 = arith.constant 0 : i32
    return %c0_i32, %c0_i32_0 : i32, i32
  }
  func.func @transform_2(%arg0: i32) -> (i32, i32) {
    %c0_i32 = arith.constant 0 : i32
    %c0_i32_0 = arith.constant 0 : i32
    %c0_i32_1 = arith.constant 0 : i32
    return %c0_i32, %c0_i32_0 : i32, i32
  }
  func.func @transform_3(%arg0: i32) -> (i32, i32) {
    %c0_i32 = arith.constant 0 : i32
    %c0_i32_0 = arith.constant 0 : i32
    %c0_i32_1 = arith.constant 0 : i32
    return %c0_i32, %c0_i32_0 : i32, i32
  }
  func.func @transform_4(%arg0: i32) -> (i32, i32) {
    %c0_i32 = arith.constant 0 : i32
    %c0_i32_0 = arith.constant 0 : i32
    %c0_i32_1 = arith.constant 0 : i32
    return %c0_i32, %c0_i32_0 : i32, i32
  }
  func.func @transform_5(%arg0: i32) -> (i32, i32) {
    %c0_i32 = arith.constant 0 : i32
    %c0_i32_0 = arith.constant 0 : i32
    %c0_i32_1 = arith.constant 0 : i32
    return %c0_i32, %c0_i32_0 : i32, i32
  }
  func.func @transform_6(%arg0: i32) -> (i32, i32) {
    %c0_i32 = arith.constant 0 : i32
    %c0_i32_0 = arith.constant 0 : i32
    %c0_i32_1 = arith.constant 0 : i32
    return %c0_i32, %c0_i32_0 : i32, i32
  }
  func.func @transform_7(%arg0: i32) -> (i32, i32) {
    %c0_i32 = arith.constant 0 : i32
    %c0_i32_0 = arith.constant 0 : i32
    %c0_i32_1 = arith.constant 0 : i32
    return %c0_i32, %c0_i32_0 : i32, i32
  }
  func.func @transform_8(%arg0: i32) -> (i32, i32) {
    %c0_i32 = arith.constant 0 : i32
    %c0_i32_0 = arith.constant 0 : i32
    %c0_i32_1 = arith.constant 0 : i32
    return %c0_i32, %c0_i32_0 : i32, i32
  }
  func.func @transform_9(%arg0: i32) -> (i32, i32) {
    %c0_i32 = arith.constant 0 : i32
    %c0_i32_0 = arith.constant 0 : i32
    %c0_i32_1 = arith.constant 0 : i32
    return %c0_i32, %c0_i32_0 : i32, i32
  }
  func.func @transform_10(%arg0: i32) -> (i32, i32) {
    %c0_i32 = arith.constant 0 : i32
    %c0_i32_0 = arith.constant 0 : i32
    %c0_i32_1 = arith.constant 0 : i32
    return %c0_i32, %c0_i32_0 : i32, i32
  }
  func.func @transform_11(%arg0: i32) -> (i32, i32) {
    %c0_i32 = arith.constant 0 : i32
    %c0_i32_0 = arith.constant 0 : i32
    %c0_i32_1 = arith.constant 0 : i32
    return %c0_i32, %c0_i32_0 : i32, i32
  }
  func.func @transform_12(%arg0: i32) -> (i32, i32) {
    %c0_i32 = arith.constant 0 : i32
    %c0_i32_0 = arith.constant 0 : i32
    %c0_i32_1 = arith.constant 0 : i32
    return %c0_i32, %c0_i32_0 : i32, i32
  }
  func.func @transform_13(%arg0: i32) -> (i32, i32) {
    %c0_i32 = arith.constant 0 : i32
    %c0_i32_0 = arith.constant 0 : i32
    %c0_i32_1 = arith.constant 0 : i32
    return %c0_i32, %c0_i32_0 : i32, i32
  }
  func.func @transform_14(%arg0: i32) -> (i32, i32) {
    %c0_i32 = arith.constant 0 : i32
    %c0_i32_0 = arith.constant 0 : i32
    %c0_i32_1 = arith.constant 0 : i32
    return %c0_i32, %c0_i32_0 : i32, i32
  }
  func.func @transform_15(%arg0: i32) -> (i32, i32) {
    %c0_i32 = arith.constant 0 : i32
    %c0_i32_0 = arith.constant 0 : i32
    return %arg0, %c0_i32 : i32, i32
  }
}

</mosaic_0001>

<bundles_post_ra>
// kernel: _feedforward_impl.1
= control target key start
LH: loop header
LB: loop body
LE: loop exit
PB: predicated region body
PF: predicated region fallthrough
CT: control target
= control target key end

     0   :  { %20 = vsyncpa [#allocation3], 0  ;;  %s2228_s0 = inlined_call_operand.vmem [shape: bf16[16,128], index: 0, kind: input, shape index: {}]   ;;  %s2229_s1 = inlined_call_operand.hbm [shape: bf16[128,512], index: 1, kind: input, shape index: {}]   ;;  %s2230_s2 = inlined_call_operand.vmem [shape: f32[1,512], index: 2, kind: input, shape index: {}]   ;;  %s2231_s3 = inlined_call_operand.hbm [shape: bf16[512,256], index: 3, kind: input, shape index: {}]   ;;  %s2232_s4 = inlined_call_operand.vmem [shape: f32[1,256], index: 4, kind: input, shape index: {}]   ;;  %s2233_s5 = inlined_call_operand.vmem [shape: f32[1,256], index: 5, kind: input, shape index: {}]   ;;  %s2234_s6 = inlined_call_operand.vmem [shape: f32[1,256], index: 6, kind: input, shape index: {}]   ;;  %s2235_s7 = inlined_call_operand.vmem [shape: bf16[256,128], index: 7, kind: input, shape index: {}]   ;;  %s2236_s8 = inlined_call_operand.vmem [shape: f32[1,128], index: 8, kind: input, shape index: {}]   ;;  %s2237_s9 = inlined_call_operand.vmem [shape: bf16[128,64], index: 9, kind: input, shape index: {}]   ;;  %s2238_s10 = inlined_call_operand.vmem [shape: f32[1,64], index: 10, kind: input, shape index: {}]   ;;  %s2239_s11 = inlined_call_operand.vmem [shape: f32[64,4], index: 11, kind: input, shape index: {}]   ;;  %s2240_s12 = inlined_call_operand.vmem [shape: f32[1,4], index: 12, kind: input, shape index: {}]   ;;  %s2241_s13 = inlined_call_operand.vmem [shape: f32[4,8], index: 13, kind: input, shape index: {}]   ;;  %s2242_s14 = inlined_call_operand.vmem [shape: f32[1,8], index: 14, kind: input, shape index: {}]   ;;  %s2243_s15 = inlined_call_operand.vmem [shape: f32[16,8], index: 15, kind: output, shape index: {}]  }
   0x1   :  { %21 = vsyncpa [#allocation5], 0  ;;  %s1968_s18 = smov [#allocation2]  }
   0x2   :  { %s29_s19 = sshll.u32 %s1968_s18, 4  ;;  %s30_s19 = int_to_ptr.vmem [resolvable:$true] %s29_s19 }
   0x3   :  { %s1932_s20 = scalar_lea.vmem %s30_s19, 4096  ;;  %p1937_p1 = scmp.lt.s32.totalorder %s30_s19, %s30_s19 }
   0x4   :  { %p1933_p0 = scmp.ne.s32.totalorder %s30_s19, %s1932_s20  ;;  %p1938_p2 = scmp.lt.s32.totalorder %s1932_s20, %s1932_s20 }
   0x6   :  { %p1939_p3 = por %p1938_p2, %p1937_p1 }
   0x8   :  { %p1940_p4 = pnand %p1939_p3, %p1933_p0 }
   0xa   :  { %1943 = shalt.err (!%p1940_p4)
}
   0xb   :  { %s1969_s21 = smov 256   ;;  %s1970_s22 = smov 16  }
   0xc   :  { %35 = dma.hbm_to_vmem [thread:$0]  %s2229_s1, 4096, %s30_s19, [#allocation3], %s1969_s21, %s1969_s21, %s1970_s22  }
   0xd   :  { %s1971_s25 = smov [#allocation4]  }
   0xe   :  { %s43_s26 = sshll.u32 %s1971_s25, 4  ;;  %s44_s26 = int_to_ptr.vmem [resolvable:$true] %s43_s26 }
   0xf   :  { %s1952_s27 = scalar_lea.vmem %s44_s26, 8192  ;;  %p1957_p6 = scmp.lt.s32.totalorder %s44_s26, %s44_s26 }
  0x10   :  { %p1953_p5 = scmp.ne.s32.totalorder %s44_s26, %s1952_s27  ;;  %p1958_p7 = scmp.lt.s32.totalorder %s1952_s27, %s1952_s27 }
  0x12   :  { %p1959_p8 = por %p1958_p7, %p1957_p6 }
  0x14   :  { %p1960_p9 = pnand %p1959_p8, %p1953_p5 }
  0x16   :  { %1963 = shalt.err (!%p1960_p9)
}
  0x17   :  { %s1972_s28 = smov 128   ;;  %s1973_s29 = smov 8  }
  0x18   :  { %49 = dma.hbm_to_vmem [thread:$0]  %s2231_s3, 8192, %s44_s26, [#allocation5], %s1972_s28, %s1972_s28, %s1973_s29  }
  0x19   :  { %1964 = dma.done.wait [#allocation3], 4096  }
  0x1a   :  { %1965 = vsyncadd [#allocation3], 4294963200 }
  0x1b   :  { %1966 = dma.done.wait [#allocation5], 8192  }
  0x1c   :  { %1967 = vsyncadd [#allocation5], 4294959104  ;;  %v1974_v0 = vmov 0   ;;  %v1747_v1 = vld [vmem:[#allocation2 + $0xe4] ss:$16 sps:$4 sm:$0xff]   ;;  %vm1976_vm0 = vmmov 0  }
  0x1d   :  { %312 = vmatprep.mubr.bf16.mxu0 %v1974_v0  ;;  %355 = vmatprep.mubr.bf16.mxu1 %v1974_v0  ;;  %v1749_v2 = vld [vmem:[#allocation2 + $0xec] ss:$16 sps:$4 sm:$0xff]   ;;  %v1751_v3 = vld [vmem:[#allocation2 + $0xe0] ss:$16 sps:$4 sm:$0xff]   ;;  %v1752_v4 = vld [vmem:[#allocation2 + $0xe8] ss:$16 sps:$4 sm:$0xff]  }
  0x1e   :  { %280 = vmatprep.subr.bf16.mxu0 %v1747_v1  ;;  %323 = vmatprep.subr.bf16.mxu1 %v1749_v2  ;;  %v1753_v5 = vld [vmem:[#allocation2 + $0xc4] ss:$16 sps:$4 sm:$0xff]   ;;  %v1755_v6 = vld [vmem:[#allocation2 + $0xcc] ss:$16 sps:$4 sm:$0xff]   ;;  %v1757_v7 = vld [vmem:[#allocation2 + $0xc0] ss:$16 sps:$4 sm:$0xff]  }
  0x1f   :  { %281 = vmatpush1.bf16.msra.mxu0 %v1751_v3  ;;  %324 = vmatpush1.bf16.msra.mxu1 %v1752_v4  ;;  %v1758_v8 = vld [vmem:[#allocation2 + $0xc8] ss:$16 sps:$4 sm:$0xff]   ;;  %v1759_v9 = vld [vmem:[#allocation2 + $0xa4] ss:$16 sps:$4 sm:$0xff]   ;;  %v1761_v10 = vld [vmem:[#allocation2 + $0xac] ss:$16 sps:$4 sm:$0xff]  }
  0x20   :  { %282 = vmatprep.subr.bf16.mxu0 %v1753_v5  ;;  %325 = vmatprep.subr.bf16.mxu1 %v1755_v6  ;;  %v1763_v11 = vld [vmem:[#allocation2 + $0xa0] ss:$16 sps:$4 sm:$0xff]   ;;  %v1764_v12 = vld [vmem:[#allocation2 + $0xa8] ss:$16 sps:$4 sm:$0xff]   ;;  %v1765_v13 = vld [vmem:[#allocation2 + $0x84] ss:$16 sps:$4 sm:$0xff]  }
  0x21   :  { %v1767_v14 = vld [vmem:[#allocation2 + $0x8c] ss:$16 sps:$4 sm:$0xff]   ;;  %v1769_v15 = vld [vmem:[#allocation2 + $0x80] ss:$16 sps:$4 sm:$0xff]   ;;  %v1770_v16 = vld [vmem:[#allocation2 + $0x88] ss:$16 sps:$4 sm:$0xff]  }
  0x22   :  { %v1771_v17 = vld [vmem:[#allocation2 + $0x64] ss:$16 sps:$4 sm:$0xff]   ;;  %v1773_v18 = vld [vmem:[#allocation2 + $0x6c] ss:$16 sps:$4 sm:$0xff]   ;;  %v1775_v19 = vld [vmem:[#allocation2 + $0x60] ss:$16 sps:$4 sm:$0xff]  }
  0x23   :  { %283 = vmatpush1.bf16.msra.mxu0 %v1757_v7  ;;  %326 = vmatpush1.bf16.msra.mxu1 %v1758_v8  ;;  %v1776_v20 = vld [vmem:[#allocation2 + $0x68] ss:$16 sps:$4 sm:$0xff]   ;;  %v1777_v21 = vld [vmem:[#allocation2 + $0x44] ss:$16 sps:$4 sm:$0xff]   ;;  %v1779_v22 = vld [vmem:[#allocation2 + $0x4c] ss:$16 sps:$4 sm:$0xff]  }
  0x24   :  { %284 = vmatprep.subr.bf16.mxu0 %v1759_v9  ;;  %327 = vmatprep.subr.bf16.mxu1 %v1761_v10  ;;  %v1781_v23 = vld [vmem:[#allocation2 + $0x40] ss:$16 sps:$4 sm:$0xff]   ;;  %v1782_v24 = vld [vmem:[#allocation2 + $0x48] ss:$16 sps:$4 sm:$0xff]   ;;  %v1783_v25 = vld [vmem:[#allocation2 + $0x24] ss:$16 sps:$4 sm:$0xff]  }
  0x25   :  { %v1785_v26 = vld [vmem:[#allocation2 + $0x2c] ss:$16 sps:$4 sm:$0xff]   ;;  %v1787_v27 = vld [vmem:[#allocation2 + $0x20] ss:$16 sps:$4 sm:$0xff]   ;;  %v1788_v28 = vld [vmem:[#allocation2 + $0x28] ss:$16 sps:$4 sm:$0xff]  }
  0x26   :  { %v1789_v29 = vld [vmem:[#allocation2 + $0x4] ss:$16 sps:$4 sm:$0xff]   ;;  %v1791_v30 = vld [vmem:[#allocation2 + $0xc] ss:$16 sps:$4 sm:$0xff]   ;;  %v1793_v31 = vld [vmem:[#allocation2] ss:$16 sps:$4 sm:$0xff]  }
  0x27   :  { %285 = vmatpush1.bf16.msra.mxu0 %v1763_v11  ;;  %328 = vmatpush1.bf16.msra.mxu1 %v1764_v12  ;;  %v1794_v32 = vld [vmem:[#allocation2 + $0x8] ss:$16 sps:$4 sm:$0xff]   ;;  %v1798_v33 = vld [vmem:[#allocation4 + $0x74] ss:$8 sps:$4 sm:$0xff]   ;;  %v1795_v35 = vld [vmem:[%s2228_s0] sm:$0xff]   ;;  %vm1323_vm1 = vcmask 523264  }
  0x28   :  { %286 = vmatprep.subr.bf16.mxu0 %v1765_v13  ;;  %329 = vmatprep.subr.bf16.mxu1 %v1767_v14  ;;  %v1801_v34 = vld [vmem:[#allocation4 + $0x174] ss:$8 sps:$4 sm:$0xff]   ;;  %v1796_v36 = vld [vmem:[#allocation4 + $0x70] ss:$8 sps:$4 sm:$0xff]   ;;  %v1804_v38 = vld [vmem:[#allocation4 + $0x64] ss:$8 sps:$4 sm:$0xff]  }
  0x29   :  { %v1799_v37 = vld [vmem:[#allocation4 + $0x170] ss:$8 sps:$4 sm:$0xff]   ;;  %v1807_v39 = vld [vmem:[#allocation4 + $0x164] ss:$8 sps:$4 sm:$0xff]   ;;  %v1802_v40 = vld [vmem:[#allocation4 + $0x60] ss:$8 sps:$4 sm:$0xff]  }
  0x2a   :  { %v1805_v41 = vld [vmem:[#allocation4 + $0x160] ss:$8 sps:$4 sm:$0xff]   ;;  %v1810_v42 = vld [vmem:[#allocation4 + $0x54] ss:$8 sps:$4 sm:$0xff]   ;;  %v1808_v44 = vld [vmem:[#allocation4 + $0x50] ss:$8 sps:$4 sm:$0xff]  }
  0x2b   :  { %287 = vmatpush1.bf16.msra.mxu0 %v1769_v15  ;;  %330 = vmatpush1.bf16.msra.mxu1 %v1770_v16  ;;  %v1813_v43 = vld [vmem:[#allocation4 + $0x154] ss:$8 sps:$4 sm:$0xff]   ;;  %v1811_v45 = vld [vmem:[#allocation4 + $0x150] ss:$8 sps:$4 sm:$0xff]   ;;  %v1816_v46 = vld [vmem:[#allocation4 + $0x44] ss:$8 sps:$4 sm:$0xff]  }
  0x2c   :  { %288 = vmatprep.subr.bf16.mxu0 %v1771_v17  ;;  %331 = vmatprep.subr.bf16.mxu1 %v1773_v18  ;;  %v1819_v47 = vld [vmem:[#allocation4 + $0x144] ss:$8 sps:$4 sm:$0xff]   ;;  %v1814_v48 = vld [vmem:[#allocation4 + $0x40] ss:$8 sps:$4 sm:$0xff]   ;;  %v1822_v50 = vld [vmem:[#allocation4 + $0x34] ss:$8 sps:$4 sm:$0xff]  }
  0x2d   :  { %v1817_v49 = vld [vmem:[#allocation4 + $0x140] ss:$8 sps:$4 sm:$0xff]   ;;  %v1825_v51 = vld [vmem:[#allocation4 + $0x134] ss:$8 sps:$4 sm:$0xff]   ;;  %v1820_v52 = vld [vmem:[#allocation4 + $0x30] ss:$8 sps:$4 sm:$0xff]  }
  0x2e   :  { %v1823_v53 = vld [vmem:[#allocation4 + $0x130] ss:$8 sps:$4 sm:$0xff]   ;;  %v1828_v54 = vld [vmem:[#allocation4 + $0x24] ss:$8 sps:$4 sm:$0xff]   ;;  %v1826_v56 = vld [vmem:[#allocation4 + $0x20] ss:$8 sps:$4 sm:$0xff]  }
  0x2f   :  { %289 = vmatpush1.bf16.msra.mxu0 %v1775_v19  ;;  %332 = vmatpush1.bf16.msra.mxu1 %v1776_v20  ;;  %v1831_v55 = vld [vmem:[#allocation4 + $0x124] ss:$8 sps:$4 sm:$0xff]   ;;  %v1829_v57 = vld [vmem:[#allocation4 + $0x120] ss:$8 sps:$4 sm:$0xff]   ;;  %v1834_v58 = vld [vmem:[#allocation4 + $0x14] ss:$8 sps:$4 sm:$0xff]  }
  0x30   :  { %290 = vmatprep.subr.bf16.mxu0 %v1777_v21  ;;  %333 = vmatprep.subr.bf16.mxu1 %v1779_v22  ;;  %v1837_v59 = vld [vmem:[#allocation4 + $0x114] ss:$8 sps:$4 sm:$0xff]   ;;  %v1832_v60 = vld [vmem:[#allocation4 + $0x10] ss:$8 sps:$4 sm:$0xff]   ;;  %v1840_v62 = vld [vmem:[#allocation4 + $0x4] ss:$8 sps:$4 sm:$0xff]  }
  0x31   :  { %v1835_v61 = vld [vmem:[#allocation4 + $0x110] ss:$8 sps:$4 sm:$0xff]   ;;  %v1843_v63 = vld [vmem:[#allocation4 + $0x104] ss:$8 sps:$4 sm:$0xff]   ;;  %v1838_v0 = vld [vmem:[#allocation4] ss:$8 sps:$4 sm:$0xff]  }
  0x32   :  { %v1841_v1 = vld [vmem:[#allocation4 + $0x100] ss:$8 sps:$4 sm:$0xff]   ;;  %v1846_v2 = vld [vmem:[#allocation4 + $0xf4] ss:$8 sps:$4 sm:$0xff]   ;;  %v1844_v4 = vld [vmem:[#allocation4 + $0xf0] ss:$8 sps:$4 sm:$0xff]  }
  0x33   :  { %291 = vmatpush1.bf16.msra.mxu0 %v1781_v23  ;;  %334 = vmatpush1.bf16.msra.mxu1 %v1782_v24  ;;  %v1849_v3 = vld [vmem:[#allocation4 + $0x1f4] ss:$8 sps:$4 sm:$0xff]   ;;  %v1847_v5 = vld [vmem:[#allocation4 + $0x1f0] ss:$8 sps:$4 sm:$0xff]   ;;  %v1852_v6 = vld [vmem:[#allocation4 + $0xe4] ss:$8 sps:$4 sm:$0xff]  }
  0x34   :  { %292 = vmatprep.subr.bf16.mxu0 %v1783_v25  ;;  %335 = vmatprep.subr.bf16.mxu1 %v1785_v26  ;;  %v1855_v7 = vld [vmem:[#allocation4 + $0x1e4] ss:$8 sps:$4 sm:$0xff]   ;;  %v1850_v8 = vld [vmem:[#allocation4 + $0xe0] ss:$8 sps:$4 sm:$0xff]   ;;  %v1858_v10 = vld [vmem:[#allocation4 + $0xd4] ss:$8 sps:$4 sm:$0xff]  }
  0x35   :  { %v1853_v9 = vld [vmem:[#allocation4 + $0x1e0] ss:$8 sps:$4 sm:$0xff]   ;;  %v1861_v11 = vld [vmem:[#allocation4 + $0x1d4] ss:$8 sps:$4 sm:$0xff]   ;;  %v1856_v12 = vld [vmem:[#allocation4 + $0xd0] ss:$8 sps:$4 sm:$0xff]  }
  0x36   :  { %v1859_v13 = vld [vmem:[#allocation4 + $0x1d0] ss:$8 sps:$4 sm:$0xff]   ;;  %v1864_v14 = vld [vmem:[#allocation4 + $0xc4] ss:$8 sps:$4 sm:$0xff]   ;;  %v1862_v16 = vld [vmem:[#allocation4 + $0xc0] ss:$8 sps:$4 sm:$0xff]  }
  0x37   :  { %293 = vmatpush1.bf16.msra.mxu0 %v1787_v27  ;;  %336 = vmatpush1.bf16.msra.mxu1 %v1788_v28  ;;  %v1867_v15 = vld [vmem:[#allocation4 + $0x1c4] ss:$8 sps:$4 sm:$0xff]   ;;  %v1865_v17 = vld [vmem:[#allocation4 + $0x1c0] ss:$8 sps:$4 sm:$0xff]   ;;  %v1870_v18 = vld [vmem:[#allocation4 + $0xb4] ss:$8 sps:$4 sm:$0xff]  }
  0x38   :  { %294 = vmatprep.subr.bf16.mxu0 %v1789_v29  ;;  %337 = vmatprep.subr.bf16.mxu1 %v1791_v30  ;;  %v1873_v19 = vld [vmem:[#allocation4 + $0x1b4] ss:$8 sps:$4 sm:$0xff]   ;;  %v1868_v20 = vld [vmem:[#allocation4 + $0xb0] ss:$8 sps:$4 sm:$0xff]   ;;  %v1876_v22 = vld [vmem:[#allocation4 + $0xa4] ss:$8 sps:$4 sm:$0xff]  }
  0x39   :  { %v1871_v21 = vld [vmem:[#allocation4 + $0x1b0] ss:$8 sps:$4 sm:$0xff]   ;;  %v1879_v23 = vld [vmem:[#allocation4 + $0x1a4] ss:$8 sps:$4 sm:$0xff]   ;;  %v1874_v24 = vld [vmem:[#allocation4 + $0xa0] ss:$8 sps:$4 sm:$0xff]  }
  0x3a   :  { %v1877_v25 = vld [vmem:[#allocation4 + $0x1a0] ss:$8 sps:$4 sm:$0xff]   ;;  %v1882_v26 = vld [vmem:[#allocation4 + $0x94] ss:$8 sps:$4 sm:$0xff]   ;;  %v1880_v28 = vld [vmem:[#allocation4 + $0x90] ss:$8 sps:$4 sm:$0xff]  }
  0x3b   :  { %295 = vmatpush1.bf16.msra.mxu0 %v1793_v31  ;;  %338 = vmatpush1.bf16.msra.mxu1 %v1794_v32  ;;  %v1885_v27 = vld [vmem:[#allocation4 + $0x194] ss:$8 sps:$4 sm:$0xff]   ;;  %v1883_v29 = vld [vmem:[#allocation4 + $0x190] ss:$8 sps:$4 sm:$0xff]   ;;  %v1888_v30 = vld [vmem:[#allocation4 + $0x84] ss:$8 sps:$4 sm:$0xff]  }
  0x3c   :  { %820 = vmatprep.subr.bf16.mxu0 %v1798_v33  ;;  %863 = vmatprep.subr.bf16.mxu1 %v1801_v34  ;;  %v1891_v31 = vld [vmem:[#allocation4 + $0x184] ss:$8 sps:$4 sm:$0xff]   ;;  %v1886_v32 = vld [vmem:[#allocation4 + $0x80] ss:$8 sps:$4 sm:$0xff]   ;;  %v1892_v34 = vld [vmem:[%s2235_s7 + $0x78] sm:$0xff]   ;;  %vm1424_vm2 = vcmask 1043456  }
  0x3d   :  { %v1889_v33 = vld [vmem:[#allocation4 + $0x180] ss:$8 sps:$4 sm:$0xff]   ;;  %vm1417_vm3 = vcmask 31744   ;;  %vm1513_vm4 = vcmask 64512  }
  0x3e   :  { %313 = vmatmul.mubr.bf16.vlgmr.msra.gmra.mxu0 %v1795_v35  ;;  %356 = vmatmul.mubr.bf16.vlgmr.msra.gmra.mxu1 %v1795_v35  ;;  %v372_v35 = vlaneseq }
  0x3f   :  { %821 = vmatpush1.bf16.msra.mxu0 %v1796_v36  ;;  %864 = vmatpush1.bf16.msra.mxu1 %v1799_v37 }
  0x40   :  { %822 = vmatprep.subr.bf16.mxu0 %v1804_v38  ;;  %865 = vmatprep.subr.bf16.mxu1 %v1807_v39  ;;  %v373_v36 = vshrl.u32 %v372_v35, 7  ;;  %v370_v39 = vld [vmem:[%s2230_s2] sm:$0xf]  ;;  %v1909_v35 = vld [vmem:[%s2237_s9 + $0x30] sm:$0xff]  }
  0x42   :  { %v2069_v37 = vsub.s32 0, %v373_v36  ;;  %v382_v38 = vsub.s32 2, %v373_v36 }
  0x43   :  { %823 = vmatpush1.bf16.msra.mxu0 %v1802_v40  ;;  %866 = vmatpush1.bf16.msra.mxu1 %v1805_v41  ;;  %v2074_v40 = vsub.s32 1, %v373_v36  ;;  %v386_v41 = vsub.s32 3, %v373_v36  ;;  %v1910_v36 = vld [vmem:[%s2237_s9 + $0x28] sm:$0xff]  }
  0x44   :  { %824 = vmatprep.subr.bf16.mxu0 %v1810_v42  ;;  %867 = vmatprep.subr.bf16.mxu1 %v1813_v43  ;;  %v375_v42 = vrot.slane %v370_v39, %v2069_v37  ;;  %v383_v43 = vrot.slane %v370_v39, %v382_v38  ;;  %v1911_v38 = vld [vmem:[%s2237_s9 + $0x20] sm:$0xff]  }
  0x47   :  { %825 = vmatpush1.bf16.msra.mxu0 %v1808_v44  ;;  %868 = vmatpush1.bf16.msra.mxu1 %v1811_v45  ;;  %v379_v44 = vrot.slane %v370_v39, %v2074_v40  ;;  %v387_v45 = vrot.slane %v370_v39, %v386_v41  ;;  %v908_v39 = vld [vmem:[%s2232_s4] sm:$0x3] }
  0x48   :  { %826 = vmatprep.subr.bf16.mxu0 %v1816_v46  ;;  %869 = vmatprep.subr.bf16.mxu1 %v1819_v47  ;;  %v392_v46 = vpack.c.bf16 %v375_v42, %v375_v42  ;;  %v394_v47 = vpack.c.bf16 %v383_v43, %v383_v43  ;;  %v913_v41 = vrot.slane %v908_v39, %v2069_v37  ;;  %v942_v43 = vld [vmem:[%s2233_s5] sm:$0x3] }
  0x49   :  { %v917_v42 = vrot.slane %v908_v39, %v2074_v40 }
  0x4b   :  { %827 = vmatpush1.bf16.msra.mxu0 %v1814_v48  ;;  %870 = vmatpush1.bf16.msra.mxu1 %v1817_v49  ;;  %v393_v48 = vpack.c.bf16 %v379_v44, %v379_v44  ;;  %v395_v49 = vpack.c.bf16 %v387_v45, %v387_v45  ;;  %v920_v44 = vpack.c.bf16 %v913_v41, %v913_v41 }
  0x4c   :  { %828 = vmatprep.subr.bf16.mxu0 %v1822_v50  ;;  %871 = vmatprep.subr.bf16.mxu1 %v1825_v51  ;;  %v397_v50 = vpack.i.b16 %v392_v46, %v392_v46  ;;  %v411_v51 = vpack.i.b16 %v394_v47, %v394_v47  ;;  %v947_v45 = vrot.slane %v942_v43, %v2069_v37  ;;  %v972_v47 = vld [vmem:[%s2234_s6] sm:$0x3] }
  0x4d   :  { %v921_v46 = vpack.c.bf16 %v917_v42, %v917_v42 }
  0x4f   :  { %829 = vmatpush1.bf16.msra.mxu0 %v1820_v52  ;;  %872 = vmatpush1.bf16.msra.mxu1 %v1823_v53 }
  0x50   :  { %830 = vmatprep.subr.bf16.mxu0 %v1828_v54  ;;  %873 = vmatprep.subr.bf16.mxu1 %v1831_v55  ;;  %v404_v54 = vpack.i.b16 %v393_v48, %v393_v48  ;;  %v418_v55 = vpack.i.b16 %v395_v49, %v395_v49 }
  0x53   :  { %831 = vmatpush1.bf16.msra.mxu0 %v1826_v56  ;;  %874 = vmatpush1.bf16.msra.mxu1 %v1829_v57 }
  0x54   :  { %832 = vmatprep.subr.bf16.mxu0 %v1834_v58  ;;  %875 = vmatprep.subr.bf16.mxu1 %v1837_v59  ;;  %v402_v58 = vrot.slane %v397_v50, %v2069_v37  ;;  %v416_v59 = vrot.slane %v411_v51, %v2069_v37  ;;  %v923_v50 = vpack.i.b16 %v920_v44, %v920_v44 }
  0x55   :  { %v951_v51 = vrot.slane %v942_v43, %v2074_v40 }
  0x57   :  { %833 = vmatpush1.bf16.msra.mxu0 %v1832_v60  ;;  %876 = vmatpush1.bf16.msra.mxu1 %v1835_v61 }
  0x58   :  { %834 = vmatprep.subr.bf16.mxu0 %v1840_v62  ;;  %877 = vmatprep.subr.bf16.mxu1 %v1843_v63 }
  0x5b   :  { %835 = vmatpush1.bf16.msra.mxu0 %v1838_v0  ;;  %878 = vmatpush1.bf16.msra.mxu1 %v1841_v1  ;;  %v409_v0 = vrot.slane %v404_v54, %v2069_v37  ;;  %v423_v1 = vrot.slane %v418_v55, %v2069_v37  ;;  %v954_v55 = vpack.c.bf16 %v947_v45, %v947_v45 }
  0x5c   :  { %836 = vmatprep.subr.bf16.mxu0 %v1846_v2  ;;  %879 = vmatprep.subr.bf16.mxu1 %v1849_v3 }
  0x5f   :  { %837 = vmatpush2.bf16.msra.mxu0 %v1844_v4  ;;  %880 = vmatpush2.bf16.msra.mxu1 %v1847_v5 }
  0x60   :  { %838 = vmatprep.subr.bf16.mxu0 %v1852_v6  ;;  %881 = vmatprep.subr.bf16.mxu1 %v1855_v7 }
  0x63   :  { %839 = vmatpush2.bf16.msra.mxu0 %v1850_v8  ;;  %882 = vmatpush2.bf16.msra.mxu1 %v1853_v9 }
  0x64   :  { %840 = vmatprep.subr.bf16.mxu0 %v1858_v10  ;;  %883 = vmatprep.subr.bf16.mxu1 %v1861_v11 }
  0x67   :  { %841 = vmatpush2.bf16.msra.mxu0 %v1856_v12  ;;  %884 = vmatpush2.bf16.msra.mxu1 %v1859_v13 }
  0x68   :  { %842 = vmatprep.subr.bf16.mxu0 %v1864_v14  ;;  %885 = vmatprep.subr.bf16.mxu1 %v1867_v15 }
  0x6b   :  { %843 = vmatpush2.bf16.msra.mxu0 %v1862_v16  ;;  %886 = vmatpush2.bf16.msra.mxu1 %v1865_v17  ;;  %v1893_v16 = vld [vmem:[%s2235_s7 + $0x38] sm:$0xff]  }
  0x6c   :  { %844 = vmatprep.subr.bf16.mxu0 %v1870_v18  ;;  %887 = vmatprep.subr.bf16.mxu1 %v1873_v19  ;;  %v1894_v19 = vld [vmem:[%s2235_s7 + $0x70] sm:$0xff]  }
  0x6f   :  { %845 = vmatpush2.bf16.msra.mxu0 %v1868_v20  ;;  %888 = vmatpush2.bf16.msra.mxu1 %v1871_v21  ;;  %v1895_v20 = vld [vmem:[%s2235_s7 + $0x30] sm:$0xff]   ;;  %v1896_v21 = vld [vmem:[%s2235_s7 + $0x68] sm:$0xff]  }
  0x70   :  { %846 = vmatprep.subr.bf16.mxu0 %v1876_v22  ;;  %889 = vmatprep.subr.bf16.mxu1 %v1879_v23  ;;  %v1897_v22 = vld [vmem:[%s2235_s7 + $0x28] sm:$0xff]   ;;  %v1898_v23 = vld [vmem:[%s2235_s7 + $0x60] sm:$0xff]  }
  0x73   :  { %847 = vmatpush2.bf16.msra.mxu0 %v1874_v24  ;;  %890 = vmatpush2.bf16.msra.mxu1 %v1877_v25  ;;  %v1899_v24 = vld [vmem:[%s2235_s7 + $0x20] sm:$0xff]   ;;  %v1900_v25 = vld [vmem:[%s2235_s7 + $0x58] sm:$0xff]  }
  0x74   :  { %848 = vmatprep.subr.bf16.mxu0 %v1882_v26  ;;  %891 = vmatprep.subr.bf16.mxu1 %v1885_v27  ;;  %v1901_v26 = vld [vmem:[%s2235_s7 + $0x18] sm:$0xff]   ;;  %v1902_v27 = vld [vmem:[%s2235_s7 + $0x50] sm:$0xff]  }
  0x77   :  { %849 = vmatpush2.bf16.msra.mxu0 %v1880_v28  ;;  %892 = vmatpush2.bf16.msra.mxu1 %v1883_v29  ;;  %v1903_v28 = vld [vmem:[%s2235_s7 + $0x10] sm:$0xff]   ;;  %v1904_v29 = vld [vmem:[%s2235_s7 + $0x48] sm:$0xff]  }
  0x78   :  { %850 = vmatprep.subr.bf16.mxu0 %v1888_v30  ;;  %893 = vmatprep.subr.bf16.mxu1 %v1891_v31  ;;  %v1905_v30 = vld [vmem:[%s2235_s7 + $0x8] sm:$0xff]   ;;  %v1906_v31 = vld [vmem:[%s2235_s7 + $0x40] sm:$0xff]  }
  0x7b   :  { %851 = vmatpush2.bf16.msra.mxu0 %v1886_v32  ;;  %894 = vmatpush2.bf16.msra.mxu1 %v1889_v33  ;;  %v1907_v32 = vld [vmem:[%s2235_s7] sm:$0xff]   ;;  %v1908_v33 = vld [vmem:[%s2237_s9 + $0x38] sm:$0xff]  }
  0x7c   :  { %1650 = vmatprep.subr.bf16.mxu0 %v1892_v34  ;;  %v1975_v34 = vmov 0.0  }
  0x7d   :  { %1694 = vmatprep.subr.bf16.mxu1 %v1975_v34 }
  0xfe   :  { %v314_v52 = vpop.f32.mrf.mxu0  ;;  %v357_v53 = vpop.f32.mrf.mxu1 }
 0x100   :  { %v316_v56 = vpop.f32.mrf.mxu0  ;;  %v359_v57 = vpop.f32.mrf.mxu1 }
 0x102   :  { %v318_v60 = vpop.f32.mrf.mxu0  ;;  %v361_v61 = vpop.f32.mrf.mxu1 }
 0x103   :  { %v366_v62 = vpack.c.bf16 %v318_v60, %v314_v52  ;;  %v368_v63 = vpack.c.bf16 %v361_v61, %v357_v53  ;;  %v977_v52 = vrot.slane %v972_v47, %v2069_v37  ;;  %v928_v60 = vrot.slane %v923_v50, %v2069_v37 }
 0x104   :  { %v320_v2 = vpop.f32.mrf.mxu0  ;;  %v363_v3 = vpop.f32.mrf.mxu1 }
 0x105   :  { %v424_v4 = vadd.bf16 %v402_v58, %v366_v62  ;;  %v426_v5 = vadd.bf16 %v416_v59, %v368_v63  ;;  %v367_v6 = vpack.c.bf16 %v320_v2, %v316_v56  ;;  %v369_v7 = vpack.c.bf16 %v363_v3, %v359_v57 }
 0x106   :  { %v930_v56 = vpack.i.b16 %v921_v46, %v921_v46  ;;  %v981_v57 = vrot.slane %v972_v47, %v2074_v40  ;;  %v955_v63 = vpack.c.bf16 %v951_v51, %v951_v51  ;;  %v1314_v51 = vld [vmem:[%s2239_s11 + $0x30] sm:$0xff] }
 0x107   :  { %v425_v8 = vadd.bf16 %v409_v0, %v367_v6  ;;  %v427_v9 = vadd.bf16 %v423_v1, %v369_v7  ;;  %v428_v10 = vmul.bf16 1009007652, %v424_v4  ;;  %v430_v11 = vmul.bf16 1009007652, %v426_v5 }
 0x108   :  { %v984_v0 = vpack.c.bf16 %v977_v52, %v977_v52  ;;  %v957_v1 = vpack.i.b16 %v954_v55, %v954_v55  ;;  %v964_v40 = vpack.i.b16 %v955_v63, %v955_v63  ;;  %v1313_v52 = vld [vmem:[%s2239_s11 + $0x28] sm:$0xff]  ;;  %v1310_v55 = vld [vmem:[%s2239_s11 + $0x10] sm:$0xff] }
 0x109   :  { %v429_v12 = vmul.bf16 1009007652, %v425_v8  ;;  %v431_v13 = vmul.bf16 1009007652, %v427_v9  ;;  %v432_v17 = vmax.bf16 %v428_v10, %v424_v4  ;;  %v434_v18 = vmax.bf16 %v430_v11, %v426_v5 }
 0x10a   :  { %v935_v4 = vrot.slane %v930_v56, %v2069_v37  ;;  %v987_v11 = vpack.i.b16 %v984_v0, %v984_v0  ;;  %v1309_v56 = vld [vmem:[%s2239_s11 + $0x8] sm:$0xff] }
 0x10b   :  { %v433_v14 = vmax.bf16 %v429_v12, %v425_v8  ;;  %v435_v15 = vmax.bf16 %v431_v13, %v427_v9  ;;  %v985_v8 = vpack.c.bf16 %v981_v57, %v981_v57  ;;  %v962_v13 = vrot.slane %v957_v1, %v2069_v37  ;;  %v1308_v57 = vld [vmem:[%s2239_s11] sm:$0xff] }
 0x10d   :  { %852 = vmatprep.mubr.bf16.mxu0 %v433_v14  ;;  %895 = vmatprep.mubr.bf16.mxu1 %v435_v15  ;;  %v994_v15 = vpack.i.b16 %v985_v8, %v985_v8  ;;  %v1409_v8 = vld [vmem:[%s2241_s13] sm:$0xf] }
 0x10e   :  { %853 = vmatmul.mubr.bf16.vlgmr.msra.gmra.mxu0 %v432_v17  ;;  %896 = vmatmul.mubr.bf16.vlgmr.msra.gmra.mxu1 %v434_v18  ;;  %v969_v18 = vrot.slane %v964_v40, %v2069_v37 }
 0x10f   :  { %1651 = vmatpush3.bf16.msra.mxu0 %v1893_v16  ;;  %1695 = vmatpush3.bf16.msra.mxu1 %v1908_v33  ;;  %v1915_v33 = vld [vmem:[%s2237_s9] sm:$0xff]  }
 0x110   :  { %1652 = vmatprep.subr.bf16.mxu0 %v1894_v19  ;;  %1696 = vmatprep.subr.bf16.mxu1 %v1975_v34  ;;  %v992_v19 = vrot.slane %v987_v11, %v2069_v37 }
 0x111   :  { %1710 = vmatprep.mubr.msk.bf16.mxu1 %vm1976_vm0, %v1975_v34 }
 0x113   :  { %1653 = vmatpush3.bf16.msra.mxu0 %v1895_v20  ;;  %1697 = vmatpush3.bf16.msra.mxu1 %v1909_v35  ;;  %v1176_v35 = vld [vmem:[%s2236_s8] sm:$0x1] }
 0x114   :  { %1654 = vmatprep.subr.bf16.mxu0 %v1896_v21  ;;  %1698 = vmatprep.subr.bf16.mxu1 %v1975_v34 }
 0x117   :  { %1655 = vmatpush3.bf16.msra.mxu0 %v1897_v22  ;;  %1699 = vmatpush3.bf16.msra.mxu1 %v1910_v36  ;;  %v999_v22 = vrot.slane %v994_v15, %v2069_v37  ;;  %v1177_v36 = vpack.c.bf16 %v1176_v35, %v1176_v35 }
 0x118   :  { %1656 = vmatprep.subr.bf16.mxu0 %v1898_v23  ;;  %1700 = vmatprep.subr.bf16.mxu1 %v1975_v34 }
 0x119   :  { %v1179_v41 = vpack.i.b16 %v1177_v36, %v1177_v36 }
 0x11b   :  { %1657 = vmatpush3.bf16.msra.mxu0 %v1899_v24  ;;  %1701 = vmatpush3.bf16.msra.mxu1 %v1911_v38  ;;  %v1184_v46 = vrot.slane %v1179_v41, %v2069_v37 }
 0x11c   :  { %1658 = vmatprep.subr.bf16.mxu0 %v1900_v25  ;;  %1702 = vmatprep.subr.bf16.mxu1 %v1975_v34 }
 0x11f   :  { %1659 = vmatpush3.bf16.msra.mxu0 %v1901_v26 }
 0x120   :  { %1660 = vmatprep.subr.bf16.mxu0 %v1902_v27 }
 0x123   :  { %1661 = vmatpush3.bf16.msra.mxu0 %v1903_v28 }
 0x124   :  { %1662 = vmatprep.subr.bf16.mxu0 %v1904_v29 }
 0x127   :  { %1663 = vmatpush3.bf16.msra.mxu0 %v1905_v30  ;;  %v1912_v30 = vld [vmem:[%s2237_s9 + $0x18] sm:$0xff]  }
 0x128   :  { %1664 = vmatprep.subr.bf16.mxu0 %v1906_v31  ;;  %1703 = vmatpush3.bf16.msra.mxu1 %v1912_v30  ;;  %v1913_v31 = vld [vmem:[%s2237_s9 + $0x10] sm:$0xff]  }
 0x129   :  { %1704 = vmatprep.subr.bf16.mxu1 %v1975_v34 }
 0x12b   :  { %1665 = vmatpush3.bf16.msra.mxu0 %v1907_v32  ;;  %v1914_v32 = vld [vmem:[%s2237_s9 + $0x8] sm:$0xff]  }
 0x12c   :  { %1705 = vmatpush3.bf16.msra.mxu1 %v1913_v31 }
 0x12d   :  { %1706 = vmatprep.subr.bf16.mxu1 %v1975_v34 }
 0x130   :  { %1707 = vmatpush3.bf16.msra.mxu1 %v1914_v32 }
 0x131   :  { %1708 = vmatprep.subr.bf16.mxu1 %v1975_v34  ;;  %v1315_v34 = vld [vmem:[%s2239_s11 + $0x38] sm:$0xff] }
 0x132   :  { %1714 = vmatprep.subr.mxu0 %v1315_v34 }
 0x134   :  { %1709 = vmatpush3.bf16.msra.mxu1 %v1915_v33 }
 0x135   :  { %1733 = vmatprep.subr.msk.mxu1 %vm1424_vm2, %v1409_v8 }
 0x1ce   :  { %v854_v48 = vpop.f32.mrf.mxu0  ;;  %v897_v49 = vpop.f32.mrf.mxu1 }
 0x1cf   :  { %v898_v61 = vadd.f32 %v897_v49, %v854_v48 }
 0x1d0   :  { %v856_v53 = vpop.f32.mrf.mxu0  ;;  %v899_v54 = vpop.f32.mrf.mxu1 }
 0x1d1   :  { %v900_v5 = vadd.f32 %v899_v54, %v856_v53  ;;  %v1312_v53 = vld [vmem:[%s2239_s11 + $0x20] sm:$0xff]  ;;  %v1311_v54 = vld [vmem:[%s2239_s11 + $0x18] sm:$0xff] }
 0x1d2   :  { %v858_v58 = vpop.f32.mrf.mxu0  ;;  %v901_v59 = vpop.f32.mrf.mxu1 }
 0x1d3   :  { %v902_v62 = vadd.f32 %v901_v59, %v858_v58  ;;  %v1294_v58 = vld [vmem:[%s2238_s10] sm:$0x1] }
 0x1d4   :  { %v860_v2 = vpop.f32.mrf.mxu0  ;;  %v903_v3 = vpop.f32.mrf.mxu1  ;;  %v1295_v59 = vpack.c.bf16 %v1294_v58, %v1294_v58 }
 0x1d5   :  { %v906_v6 = vpack.c.bf16 %v902_v62, %v898_v61  ;;  %v904_v7 = vadd.f32 %v903_v3, %v860_v2 }
 0x1d7   :  { %v936_v9 = vadd.bf16 %v928_v60, %v906_v6  ;;  %v907_v10 = vpack.c.bf16 %v904_v7, %v900_v5  ;;  %v1297_v60 = vpack.i.b16 %v1295_v59, %v1295_v59 }
 0x1d9   :  { %v938_v12 = vmul.bf16 1009007652, %v936_v9  ;;  %v937_v14 = vadd.bf16 %v935_v4, %v907_v10  ;;  %v1302_v63 = vrot.slane %v1297_v60, %v2069_v37  ;;  %v1643_v37 = vld [vmem:[%s2240_s12] ss:$0 sm:$0xff] }
 0x1db   :  { %v940_v16 = vmax.bf16 %v938_v12, %v936_v9  ;;  %v939_v17 = vmul.bf16 1009007652, %v937_v14 }
 0x1dd   :  { %v970_v20 = vmul.bf16 %v962_v13, %v940_v16  ;;  %v941_v21 = vmax.bf16 %v939_v17, %v937_v14  ;;  %v1646_v16 = vld [vmem:[%s2242_s14] ss:$0 sm:$0xff] }
 0x1df   :  { %v971_v23 = vmul.bf16 %v969_v18, %v941_v21  ;;  %v1000_v24 = vadd.bf16 %v992_v19, %v970_v20 }
 0x1e1   :  { %v1001_v25 = vadd.bf16 %v999_v22, %v971_v23  ;;  %v1002_v26 = vmul.bf16 1009007652, %v1000_v24 }
 0x1e3   :  { %v1003_v27 = vmul.bf16 1009007652, %v1001_v25  ;;  %v1004_v29 = vmax.bf16 %v1002_v26, %v1000_v24 }
 0x1e5   :  { %v1005_v28 = vmax.bf16 %v1003_v27, %v1001_v25 }
 0x1e7   :  { %1166 = vmatprep.mubr.bf16.mxu0 %v1005_v28 }
 0x1e8   :  { %1167 = vmatmul.mubr.bf16.vlgmr.msra.gmra.mxu0 %v1004_v29 }
 0x1e9   :  { %1715 = vmatpush3.msra.mxu0 %v1315_v34 }
 0x1ea   :  { %1716 = vmatprep.subr.mxu0 %v1314_v51 }
 0x1eb   :  { %1717 = vmatpush3.msra.mxu0 %v1314_v51 }
 0x1ec   :  { %1718 = vmatprep.subr.mxu0 %v1313_v52 }
 0x1ed   :  { %1719 = vmatpush3.msra.mxu0 %v1313_v52 }
 0x1ee   :  { %1720 = vmatprep.subr.mxu0 %v1312_v53 }
 0x1ef   :  { %1721 = vmatpush3.msra.mxu0 %v1312_v53 }
 0x1f0   :  { %1722 = vmatprep.subr.mxu0 %v1311_v54 }
 0x1f1   :  { %1723 = vmatpush3.msra.mxu0 %v1311_v54 }
 0x1f2   :  { %1724 = vmatprep.subr.mxu0 %v1310_v55 }
 0x1f3   :  { %1725 = vmatpush3.msra.mxu0 %v1310_v55 }
 0x1f4   :  { %1726 = vmatprep.subr.mxu0 %v1309_v56 }
 0x1f5   :  { %1727 = vmatpush3.msra.mxu0 %v1309_v56 }
 0x1f6   :  { %1728 = vmatprep.subr.mxu0 %v1308_v57 }
 0x1f7   :  { %1729 = vmatpush3.msra.mxu0 %v1308_v57 }
 0x2a8   :  { %v1666_v38 = vpop.f32.mrf.mxu0 }
 0x2aa   :  { %v1667_v39 = vpop.f32.mrf.mxu0 }
 0x2ab   :  { %v1668_v44 = vadd.f32 %v1667_v39, %v1666_v38 }
 0x2ac   :  { %v1669_v42 = vpop.f32.mrf.mxu0 }
 0x2ae   :  { %v1670_v43 = vpop.f32.mrf.mxu0 }
 0x2af   :  { %v1671_v45 = vadd.f32 %v1670_v43, %v1669_v42 }
 0x2b1   :  { %v1175_v47 = vpack.c.bf16 %v1671_v45, %v1668_v44 }
 0x2b3   :  { %v1185_v48 = vadd.bf16 %v1184_v46, %v1175_v47 }
 0x2b5   :  { %v1186_v49 = vmul.bf16 1009007652, %v1185_v48 }
 0x2b7   :  { %v1187_v50 = vmax.bf16 %v1186_v49, %v1185_v48 }
 0x2b9   :  { %1711 = vmatmul.mubr.bf16.vlgmr.msra.gmra.mxu1 %v1187_v50 }
 0x2ba   :  { %1734 = vmatpush3.msk.msra.mxu1 %vm1424_vm2, %v1409_v8 }
 0x379   :  { %v1286_v61 = vpop.f32.mrf.mxu1 }
 0x37b   :  { %v1712_v62 = vpop.f32.mrf.mxu1 }
 0x37d   :  { %v1289_v0 = vpop.f32.mrf.mxu1 }
 0x37e   :  { %v1293_v1 = vpack.c.bf16 %v1289_v0, %v1286_v61 }
 0x37f   :  { %v1713_v2 = vpop.f32.mrf.mxu1 }
 0x380   :  { %v1303_v3 = vadd.bf16 %v1302_v63, %v1293_v1 }
 0x382   :  { %v1304_v4 = vmul.bf16 1009007652, %v1303_v3 }
 0x384   :  { %v1305_v5 = vmax.bf16 %v1304_v4, %v1303_v3 }
 0x386   :  { %v1306_v6 = vunpack.c.l.bf16 %v1305_v5  ;;  %v1307_v7 = vunpack.c.h.bf16 %v1305_v5 }
 0x388   :  { %1730 = vmatprep.mubr.msk.f32.mxu0 %vm1323_vm1, %v1306_v6 }
 0x389   :  { %1731 = vmatmul.mubr.msk.f32.vlgmr.msra.gmra.mxu0 %vm1323_vm1, %v1307_v7 }
 0x449   :  { %v1732_v9 = vpop.f32.mrf.mxu0 }
 0x44a   :  { %v1402_v10 = vadd.f32 %v1732_v9, %v1643_v37 }
 0x44b   :  { %v1396_v40 = vpop.f32.mrf.mxu0 }
 0x44c   :  { %v1397_v11 = vadd.f32 %v1643_v37, %v1396_v40  ;;  %v1406_v12 = vmul.f32 0.01, %v1402_v10 }
 0x44e   :  { %v1405_v13 = vmul.f32 0.01, %v1397_v11  ;;  %v1408_v15 = vmax.f32 %v1402_v10, %v1406_v12 }
 0x450   :  { %v1407_v14 = vmax.f32 %v1397_v11, %v1405_v13 }
 0x452   :  { %1735 = vmatprep.mubr.msk.f32.mxu1 %vm1417_vm3, %v1407_v14 }
 0x453   :  { %1736 = vmatmul.mubr.msk.f32.vlgmr.msra.gmra.mxu1 %vm1417_vm3, %v1408_v15 }
 0x513   :  { %v1737_v17 = vpop.f32.mrf.mxu1 }
 0x514   :  { %v1500_v18 = vadd.f32 %v1737_v17, %v1646_v16 }
 0x515   :  { %v1494_v19 = vpop.f32.mrf.mxu1 }
 0x516   :  { %v1504_v20 = vsub.f32 0.0, %v1500_v18  ;;  %v1495_v21 = vadd.f32 %v1646_v16, %v1494_v19 }
 0x518   :  { %v1507_v22 = vmul.f32 1.442695, %v1504_v20  ;;  %v1503_v23 = vsub.f32 0.0, %v1495_v21 }
 0x51a   :  { %1916 = vpow2.f32 %v1507_v22  ;;  %v1505_v24 = vmul.f32 1.442695, %v1503_v23 }
 0x51c   :  { %1918 = vpow2.f32 %v1505_v24 }
 0x527   :  { %v1917_v25 = vpop.eup %1916 }
 0x528   :  { %v1510_v26 = vadd.f32 1.0, %v1917_v25 }
 0x529   :  { %v1919_v27 = vpop.eup %1918 }
 0x52a   :  { %1920 = vrcp.f32 %v1510_v26  ;;  %v1509_v28 = vadd.f32 1.0, %v1919_v27 }
 0x52c   :  { %1922 = vrcp.f32 %v1509_v28 }
 0x537   :  { %v1921_v29 = vpop.eup %1920 }
 0x538   :  { %1515 = vst.msk [vmem:[%s2243_s15 + $0x8] sm:$0xff] %vm1513_vm4, %v1921_v29 }
 0x539   :  { %v1923_v30 = vpop.eup %1922 }
 0x53a   :  { %1514 = vst.msk [vmem:[%s2243_s15] sm:$0xff] %vm1513_vm4, %v1923_v30 }
 0x53b   :  { %1520 = vsyncpa [#allocation3], 1 }
 0x53c   :  { %1521 = vsyncpa [#allocation5], 1 }

</bundles_post_ra>
